<compile_context>
chip_gen: v5e
topology: v5e:2x2
jax: 0.10.0
libtpu: 0.0.40
codegen_flags: <defaults>
</compile_context>

<pallas_src>
import functools
import math

import jax
import jax.numpy as jnp
from jax.experimental import pallas as pl
from jax.experimental.pallas import tpu as pltpu


def make_sinusoidal_pe(max_len: int, d_model: int) -> jnp.ndarray:
    """Deterministic buffer identical to the PyTorch __init__ (shape (max_len, d_model))."""
    position = jnp.arange(max_len, dtype=jnp.float32)[:, None]                 # (max_len, 1)
    div_term = jnp.exp(
        jnp.arange(0, d_model, 2, dtype=jnp.float32) * (-math.log(10000.0) / d_model)
    )                                                                           # (d_model//2,)
    angles = position * div_term                                                # (max_len, d_model//2)
    pe = jnp.zeros((max_len, d_model), dtype=jnp.float32)
    pe = pe.at[:, 0::2].set(jnp.sin(angles))
    pe = pe.at[:, 1::2].set(jnp.cos(angles))
    return pe


def _choose_tile_l(L: int, B: int, itemsize: int, target_bytes: int = 1 << 20) -> int:
    """Largest multiple of 128 that divides L while keeping a (B, tile) block ~<= target."""
    if L % 128 != 0:
        # TODO(synk): non-128-multiple S*D falls back to one full-row block
        # (fine for typical transformer shapes where d_model % 128 == 0).
        return L
    target_elems = max(128, target_bytes // (itemsize * max(B, 1)))
    n128 = L // 128
    best = 128
    for d in range(1, n128 + 1):
        if n128 % d != 0:
            continue
        cand = d * 128
        if cand > target_elems:
            break
        best = cand
    return best


_M1 = 0x9E3779B9   # golden-ratio mix constant
_M2 = 0x85EBCA6B   # murmur3 fmix32
_M3 = 0xC2B2AE35


def _pe_dropout_kernel(seed_ref, x_ref, pe_ref, o_ref, *,
                       p, apply_dropout, tile_l, row_len):
    # x_ref / o_ref: (B, tile_l) VMEM tile; pe_ref: (1, tile_l) (broadcast over batch).
    y = x_ref[...] + pe_ref[...]

    if apply_dropout and p > 0.0:
        if p >= 1.0:
            y = jnp.zeros_like(y)
        else:
            t = pl.program_id(0)
            # Global flat element index for every element of this block.
            row = jax.lax.broadcasted_iota(jnp.int32, y.shape, 0).astype(jnp.uint32)
            col = jax.lax.broadcasted_iota(jnp.int32, y.shape, 1).astype(jnp.uint32)
            idx = (row * jnp.uint32(row_len)
                   + t.astype(jnp.uint32) * jnp.uint32(tile_l)
                   + col)
            # Stateless hash PRNG: murmur3 finalizer of (index ^ seed * phi).
            h = idx ^ (seed_ref[0].astype(jnp.uint32) * jnp.uint32(_M1))
            h = h ^ (h >> 16)
            h = h * jnp.uint32(_M2)
            h = h ^ (h >> 13)
            h = h * jnp.uint32(_M3)
            h = h ^ (h >> 16)
            thresh = jnp.uint32(min(int(round(p * 2.0 ** 32)), 2 ** 32 - 1))
            keep = h >= thresh
            y = jnp.where(keep, y * (1.0 / (1.0 - p)), jnp.zeros_like(y))

    o_ref[...] = y


def positional_encoding_forward(x, pe, *, offset=0, dropout_p=0.1, train=False, seed=0):
    """Equivalent of PositionalEncoding.forward(x, offset).

    x:  (B, S, D) float32
    pe: (max_len, D) float32 sinusoidal table
    """
    B, S, D = x.shape
    L = S * D

    # pe[offset:offset+S], then flatten to a lane-dense (1, S*D) slab.
    pe_slice = jax.lax.dynamic_slice(pe, (offset, 0), (S, D)).astype(x.dtype)
    x2 = x.reshape(B, L)
    pe2 = pe_slice.reshape(1, L)

    itemsize = jnp.dtype(x.dtype).itemsize
    tile_l = _choose_tile_l(L, B, itemsize)
    num_tiles = L // tile_l

    kernel = functools.partial(
        _pe_dropout_kernel,
        p=float(dropout_p), apply_dropout=bool(train),
        tile_l=tile_l, row_len=L,
    )
    seed_arr = jnp.array([seed], dtype=jnp.int32)

    # (x-in + out) tiles double-buffered + pe tile double-buffered, plus headroom.
    step_bytes = (2 * B * tile_l + tile_l) * itemsize
    vmem_limit = int(min(max(2 * step_bytes + (2 << 20), 8 << 20), 64 << 20))

    out2 = pl.pallas_call(
        kernel,
        out_shape=jax.ShapeDtypeStruct((B, L), x.dtype),
        grid_spec=pltpu.PrefetchScalarGridSpec(
            num_scalar_prefetch=1,
            grid=(num_tiles,),
            in_specs=[
                pl.BlockSpec((B, tile_l), lambda t, seed: (0, t)),   # x
                pl.BlockSpec((1, tile_l), lambda t, seed: (0, t)),   # pe
            ],
            out_specs=pl.BlockSpec((B, tile_l), lambda t, seed: (0, t)),
        ),
        compiler_params=pltpu.CompilerParams(
            dimension_semantics=("parallel",),
            vmem_limit_bytes=vmem_limit,
        ),
    )(seed_arr, x2, pe2)

    return out2.reshape(B, S, D)


if __name__ == "__main__":
    # Small shapes consistent with the module: batch=2, seq=8, d_model=32.
    B, S, D = 2, 8, 32
    MAX_LEN = 64
    OFFSET = 3
    P = 0.1

    key = jax.random.PRNGKey(0)
    x = jax.random.normal(key, (B, S, D), dtype=jnp.float32)
    pe = make_sinusoidal_pe(MAX_LEN, D)

    # Eval mode (dropout is identity) — exact check against the reference math.
    out_eval = positional_encoding_forward(x, pe, offset=OFFSET, dropout_p=P, train=False)
    out_eval = jax.block_until_ready(out_eval)
    ref = x + pe[None, OFFSET:OFFSET + S, :]
    assert out_eval.shape == (B, S, D)
    assert jnp.allclose(out_eval, ref, atol=1e-6, rtol=1e-6), "eval-mode mismatch"

    # Training mode (in-kernel Bernoulli dropout): kept elements equal ref/(1-p),
    # dropped elements are exactly zero.
    out_train = positional_encoding_forward(
        x, pe, offset=OFFSET, dropout_p=P, train=True, seed=42
    )
    out_train = jax.block_until_ready(out_train)
    assert out_train.shape == (B, S, D)
    kept = out_train != 0.0
    assert jnp.allclose(
        jnp.where(kept, out_train, 0.0),
        jnp.where(kept, ref / (1.0 - P), 0.0),
        atol=1e-5, rtol=1e-5,
    ), "train-mode mismatch on kept elements"

    print("KERNEL_OK")
</pallas_src>

<mosaic_0001>
module attributes {stable_mosaic.version = 11 : i64} {
  func.func @_pe_dropout_kernel(%arg0: i32, %arg1: memref<1xi32, #tpu.memory_space<smem>>, %arg2: memref<2x256xf32, #tpu.memory_space<vmem>>, %arg3: memref<1x256xf32, #tpu.memory_space<vmem>>, %arg4: memref<2x256xf32, #tpu.memory_space<vmem>>) attributes {dimension_semantics = [#tpu.dimension_semantics<parallel>], iteration_bounds = array<i64: 1>, scalar_prefetch = 1 : i64, scratch_operands = 0 : i64, tpu.core_type = #tpu.core_type<tc>, window_params = [{transform_indices = @transform_0, window_bounds = array<i64: 2, 256>}, {transform_indices = @transform_1, window_bounds = array<i64: 1, 256>}, {transform_indices = @transform_2, window_bounds = array<i64: 2, 256>}]} {
    %c0 = arith.constant 0 : index
    %c0_0 = arith.constant 0 : index
    %0 = vector.load %arg2[%c0, %c0_0] : memref<2x256xf32, #tpu.memory_space<vmem>>, vector<2x256xf32>
    %c0_1 = arith.constant 0 : index
    %c0_2 = arith.constant 0 : index
    %1 = vector.load %arg3[%c0_1, %c0_2] : memref<1x256xf32, #tpu.memory_space<vmem>>, vector<1x256xf32>
    %2 = vector.broadcast %1 : vector<1x256xf32> to vector<2x256xf32>
    %3 = arith.addf %0, %2 : vector<2x256xf32>
    %c0_3 = arith.constant 0 : index
    %c0_4 = arith.constant 0 : index
    %4 = vector.load %arg4[%c0_3, %c0_4] : memref<2x256xf32, #tpu.memory_space<vmem>>, vector<2x256xf32>
    tpu.vector_store %arg4[%c0_3, %c0_4], %3 {strides = array<i32>} : memref<2x256xf32, #tpu.memory_space<vmem>>, vector<2x256xf32>,
    return
  }
  func.func @transform_0(%arg0: i32, %arg1: memref<1xi32, #tpu.memory_space<smem>>) -> (i32, i32) {
    %c0_i32 = arith.constant 0 : i32
    %c0_i32_0 = arith.constant 0 : i32
    return %c0_i32, %arg0 : i32, i32
  }
  func.func @transform_1(%arg0: i32, %arg1: memref<1xi32, #tpu.memory_space<smem>>) -> (i32, i32) {
    %c0_i32 = arith.constant 0 : i32
    %c0_i32_0 = arith.constant 0 : i32
    return %c0_i32, %arg0 : i32, i32
  }
  func.func @transform_2(%arg0: i32, %arg1: memref<1xi32, #tpu.memory_space<smem>>) -> (i32, i32) {
    %c0_i32 = arith.constant 0 : i32
    %c0_i32_0 = arith.constant 0 : i32
    return %c0_i32, %arg0 : i32, i32
  }
}

</mosaic_0001>

<bundles_post_ra>
// kernel: tpu_custom_call.1
= control target key start
LH: loop header
LB: loop body
LE: loop exit
PB: predicated region body
PF: predicated region fallthrough
CT: control target
= control target key end

     0   :  { %9 = vsyncpa [#allocation5], 0  ;;  %s141_s0 = inlined_call_operand.<no memory space> [shape: s32[1], index: 0, kind: input, shape index: {}]   ;;  %s142_s1 = inlined_call_operand.hbm [shape: f32[2,256], index: 1, kind: input, shape index: {}]   ;;  %s143_s2 = inlined_call_operand.vmem [shape: f32[1,256], index: 2, kind: input, shape index: {}]   ;;  %s144_s3 = inlined_call_operand.hbm [shape: f32[2,256], index: 3, kind: output, shape index: {}]  }
   0x1   :  { %10 = vsyncpa [#allocation6], 0  ;;  %s16_s14 = sshll.u32 %s142_s1, 4  ;;  %s110_s15 = smov [#allocation4]   ;;  %s17_s14 = int_to_ptr.hbm [resolvable:$true] %s16_s14 }
   0x2   :  { %s18_s16 = sshll.u32 %s110_s15, 4  ;;  %s19_s16 = int_to_ptr.vmem [resolvable:$true] %s18_s16 }
   0x3   :  { %21 = dma.hbm_to_vmem [thread:$0]  %s17_s14, 64, %s19_s16, [#allocation5]  }
   0x4   :  { %106 = dma.done.wait [#allocation5], 64  }
   0x5   :  { %107 = vsyncadd [#allocation5], 4294967232  ;;  %v29_v0 = vld [vmem:[%s143_s2] sm:$0x3]  ;;  %vm34_vm0 = vcmask 1041408   ;;  %s111_s18 = smov [#allocation7]  }
   0x6   :  { %v31_v1 = vperm.slane %v29_v0, 0  ;;  %v32_v2 = vperm.slane %v29_v0, 1  ;;  %v28_v3 = vld [vmem:[#allocation4] sm:$0xf]  ;;  %s44_s19 = sshll.u32 %s111_s18, 4  ;;  %s46_s21 = sshll.u32 %s144_s3, 4  ;;  %s45_s19 = int_to_ptr.vmem [resolvable:$true] %s44_s19  ;;  %s47_s21 = int_to_ptr.hbm [resolvable:$true] %s46_s21 }
   0x8   :  { %v33_v4 = vrot.slane %v32_v2, 6 }
   0xa   :  { %v35_v5 = vsel %vm34_vm0, %v31_v1, %v33_v4 }
   0xb   :  { %v37_v6 = vadd.f32 %v35_v5, %v28_v3 }
   0xd   :  { %38 = vst [vmem:[#allocation7] sm:$0xf] %v37_v6 }
   0xe   :  { %49 = dma.vmem_to_hbm [thread:$0]  %s45_s19, 64, %s47_s21, [#allocation6]  }
   0xf   :  { %108 = dma.done.wait [#allocation6], 64  }
  0x10   :  { %109 = vsyncadd [#allocation6], 4294967232 }
  0x11   :  { %54 = vsyncpa [#allocation5], 1 }
  0x12   :  { %55 = vsyncpa [#allocation6], 1 }

</bundles_post_ra>
